<compile_context>
chip_gen: v5e
topology: v5e:2x2
jax: 0.10.0
libtpu: 0.0.40
codegen_flags: <defaults>
</compile_context>

<pallas_src>
import jax
import jax.numpy as jnp
import numpy as np
from jax.experimental import pallas as pl
from jax.experimental.pallas import tpu as pltpu

_EPS = 1e-5


def _make_kernel(*, K, E, hidden, stride, tl, num_tiles, L, p, l_scr):
    tl_step = tl * stride  # output-tile step measured in (padded) input elements

    def kernel(x_ref, w1_ref, b1_ref, w2_ref, b2_ref, o_ref, xh_ref):
        # x_ref : (1, C_in, L)     un-padded sample, resident across the L-tile axis
        # w1_ref: (K, hidden, 1)   depthwise tap weights, BN1 scale folded, h' = e*C_in+c
        # b1_ref: (hidden, 1)      folded BN1 bias
        # w2_ref: (C_out, hidden)  pointwise weights, BN2 scale folded (mxu dtype)
        # b2_ref: (C_out, 1)       folded BN2 bias (f32)
        # o_ref : (1, C_out, tl)   output tile, NCL, lane-dense along L
        # xh_ref: (hidden, l_scr)  VMEM scratch: zero-padded, E-replicated sample

        def fill_scratch():
            # Zero the conv-padding columns, then write the E-fold replicated sample.
            if p > 0:
                xh_ref[:, :p] = jnp.zeros((hidden, p), jnp.float32)
            if l_scr > p + L:
                xh_ref[:, p + L:] = jnp.zeros((hidden, l_scr - p - L), jnp.float32)
            xh_ref[:, p:p + L] = jnp.tile(x_ref[0].astype(jnp.float32), (E, 1))

        if num_tiles == 1:
            fill_scratch()
            base = 0
        else:
            @pl.when(pl.program_id(1) == 0)
            def _():
                fill_scratch()
            base = pl.program_id(1) * tl_step
            if tl_step % 128 == 0:
                base = pl.multiple_of(base, 128)

        # Depthwise conv + BN1 bias + ReLU, computed directly in the stacked
        # (hidden, tl) layout. Each tap is re-read from the VMEM scratch so only the
        # accumulator stays live in vregs; tap weights broadcast from (hidden, 1).
        acc = jnp.zeros((hidden, tl), jnp.float32)
        for k in range(K):
            if stride == 1:
                tap = xh_ref[:, pl.ds(base + k, tl)]
            else:
                tap = xh_ref[:, pl.ds(base + k, tl, stride=stride)]
            acc = acc + tap * w1_ref[k]
        y = jnp.maximum(acc + b1_ref[...], 0.0)

        # Pointwise 1x1 conv + BN2: one MXU dot with contraction = hidden (= E*C_in),
        # inputs in w2_ref.dtype (bf16 by default), f32 accumulation.
        z = jnp.dot(w2_ref[...], y.astype(w2_ref.dtype),
                    preferred_element_type=jnp.float32)
        o_ref[0, :, :] = (z + b2_ref[...]).astype(o_ref.dtype)

    return kernel


def separable_conv1d_pallas(x, params, *, kernel_size, stride, expand_ratio,
                            max_tile_l=1024, mxu_dtype=jnp.bfloat16):
    """x: (N, C_in, L) float32 (PyTorch NCL).  Returns (N, C_out, L_out) in NCL."""
    del expand_ratio  # implied by the weight shapes
    (w1, g1, be1, m1, v1, w2, g2, be2, m2, v2) = params
    N, C_in, L = x.shape
    hidden = w1.shape[0]
    C_out = w2.shape[0]
    K = kernel_size
    if hidden % C_in != 0:
        raise ValueError("hidden dim must be an exact multiple of in_channels")
    E = hidden // C_in

    p = (K - 1) // 2
    l_out = (L + 2 * p - K) // stride + 1

    # L-tile selection: one tile when it fits; otherwise 128-aligned tiles sized so
    # the live (hidden, tl) f32 accumulator + bf16 copy stay within a modest budget.
    if l_out <= max_tile_l:
        tl = l_out
    else:
        budget = max(128, (192 * 1024) // (8 * hidden))
        tl = min(max_tile_l, max(128, (budget // 128) * 128))
    num_tiles = pl.cdiv(l_out, tl)

    # Scratch length: left pad p + data + right zeros covering the last tile's window
    # (last tile may overhang l_out; its extra lanes compute on zeros and are dropped).
    l_scr = max(p + L, (num_tiles * tl - 1) * stride + K)

    # ---- fold BatchNorm (inference) into the conv weights; keep only the biases ----
    inv1 = g1 / jnp.sqrt(v1 + _EPS)                      # (hidden,)
    inv2 = g2 / jnp.sqrt(v2 + _EPS)                      # (C_out,)
    b1f = be1 - m1 * inv1
    b2f = be2 - m2 * inv2

    # PyTorch grouped-conv hidden channel h = c*E + e is reordered to h' = e*C_in + c
    # so the E-replicated sample (jnp.tile along sublanes) lines up with the weights.
    w1s = (w1 * inv1[:, None]).astype(jnp.float32)                       # (hidden, K)
    w1p = jnp.transpose(w1s.reshape(C_in, E, K), (2, 1, 0)).reshape(K, hidden, 1)
    b1p = jnp.transpose(b1f.reshape(C_in, E), (1, 0)).reshape(hidden, 1)
    b1p = b1p.astype(jnp.float32)
    w2s = (w2 * inv2[:, None]).astype(jnp.float32)                       # (C_out, hidden)
    w2p = jnp.transpose(w2s.reshape(C_out, C_in, E), (0, 2, 1)).reshape(C_out, hidden)
    w2p = w2p.astype(mxu_dtype)
    b2p = b2f.reshape(C_out, 1).astype(jnp.float32)

    # ---- VMEM accounting: pipelined blocks are double-buffered ----
    mxu_bytes = jnp.dtype(mxu_dtype).itemsize
    out_bytes = jnp.dtype(x.dtype).itemsize
    need = (2 * C_in * L * 4                        # input block x2 buffers
            + 2 * C_out * tl * out_bytes            # output block x2 buffers
            + hidden * l_scr * 4                    # padded / replicated scratch
            + 2 * (w1p.size + b1p.size + b2p.size) * 4 + 2 * w2p.size * mxu_bytes
            + hidden * tl * (4 + mxu_bytes) + C_out * tl * 4  # live intermediates
            + (2 << 20))                            # compiler scratch headroom
    try:
        vmem_cap = int(pltpu.get_tpu_info().vmem_capacity_bytes)
    except Exception:
        vmem_cap = 64 << 20
    vmem_limit = int(min(int(0.9 * vmem_cap), max(32 << 20, int(need))))

    kernel = _make_kernel(K=K, E=E, hidden=hidden, stride=stride, tl=tl,
                          num_tiles=num_tiles, L=L, p=p, l_scr=l_scr)

    out = pl.pallas_call(
        kernel,
        out_shape=jax.ShapeDtypeStruct((N, C_out, l_out), x.dtype),
        grid=(N, num_tiles),
        in_specs=[
            pl.BlockSpec((1, C_in, L), lambda n, j: (n, 0, 0)),
            pl.BlockSpec((K, hidden, 1), lambda n, j: (0, 0, 0)),
            pl.BlockSpec((hidden, 1), lambda n, j: (0, 0)),
            pl.BlockSpec((C_out, hidden), lambda n, j: (0, 0)),
            pl.BlockSpec((C_out, 1), lambda n, j: (0, 0)),
        ],
        out_specs=pl.BlockSpec((1, C_out, tl), lambda n, j: (n, 0, j)),
        scratch_shapes=[pltpu.VMEM((hidden, l_scr), jnp.float32)],
        compiler_params=pltpu.CompilerParams(
            # j is "arbitrary": the per-sample scratch is filled at j == 0 and reused
            # by the following L-tiles, so the L-tile axis must stay on one core.
            dimension_semantics=("parallel", "arbitrary"),
            vmem_limit_bytes=vmem_limit,
        ),
    )(x, w1p, b1p, w2p, b2p)

    return out


def _reference(x, params, *, kernel_size, stride):
    """Pure-JAX reference matching the PyTorch module in eval mode (NCL output)."""
    (w1, g1, be1, m1, v1, w2, g2, be2, m2, v2) = params
    p = (kernel_size - 1) // 2
    hp = jax.lax.Precision.HIGHEST
    dw = jax.lax.conv_general_dilated(
        x, w1[:, None, :], window_strides=(stride,), padding=[(p, p)],
        feature_group_count=x.shape[1], dimension_numbers=("NCH", "OIH", "NCH"),
        precision=hp)
    y = (dw - m1[None, :, None]) / jnp.sqrt(v1[None, :, None] + _EPS)
    y = y * g1[None, :, None] + be1[None, :, None]
    y = jnp.maximum(y, 0.0)
    z = jnp.einsum("nhl,oh->nol", y, w2, precision=hp)
    z = (z - m2[None, :, None]) / jnp.sqrt(v2[None, :, None] + _EPS)
    z = z * g2[None, :, None] + be2[None, :, None]
    return z


def _make_params(key, C_in, C_out, kernel_size, expand_ratio):
    hidden = int(round(C_in * expand_ratio))
    ks = jax.random.split(key, 11)
    w1 = 0.5 * jax.random.normal(ks[1], (hidden, kernel_size), jnp.float32)
    g1 = 1.0 + 0.1 * jax.random.normal(ks[2], (hidden,), jnp.float32)
    be1 = 0.1 * jax.random.normal(ks[3], (hidden,), jnp.float32)
    m1 = 0.1 * jax.random.normal(ks[4], (hidden,), jnp.float32)
    v1 = 0.5 + jnp.abs(jax.random.normal(ks[5], (hidden,), jnp.float32))
    w2 = 0.5 * jax.random.normal(ks[6], (C_out, hidden), jnp.float32)
    g2 = 1.0 + 0.1 * jax.random.normal(ks[7], (C_out,), jnp.float32)
    be2 = 0.1 * jax.random.normal(ks[8], (C_out,), jnp.float32)
    m2 = 0.1 * jax.random.normal(ks[9], (C_out,), jnp.float32)
    v2 = 0.5 + jnp.abs(jax.random.normal(ks[10], (C_out,), jnp.float32))
    return (w1, g1, be1, m1, v1, w2, g2, be2, m2, v2)


if __name__ == "__main__":
    key = jax.random.PRNGKey(0)

    # --- Config A: SeparableConv1d(4, 8, k=3, stride=1, expand=2), small L (f32 MXU) ---
    N, C_in, L = 2, 4, 16
    kernel_size, stride, expand_ratio, C_out = 3, 1, 2, 8
    kx, kp = jax.random.split(key)
    x = jax.random.normal(kx, (N, C_in, L), jnp.float32)
    params = _make_params(kp, C_in, C_out, kernel_size, expand_ratio)

    out = separable_conv1d_pallas(x, params, kernel_size=kernel_size, stride=stride,
                                  expand_ratio=expand_ratio, mxu_dtype=jnp.float32)
    out = jax.block_until_ready(out)
    ref = _reference(x, params, kernel_size=kernel_size, stride=stride)
    np.testing.assert_allclose(np.asarray(out), np.asarray(ref), rtol=1e-4, atol=1e-4)

    # --- Config B: wider shapes (C_in=8, expand=4, L=384), f32 and default bf16 MXU ---
    N2, C_in2, L2 = 2, 8, 384
    k2, s2, e2, C_out2 = 3, 1, 4, 16
    kx2, kp2 = jax.random.split(jax.random.PRNGKey(1))
    x2 = jax.random.normal(kx2, (N2, C_in2, L2), jnp.float32)
    params2 = _make_params(kp2, C_in2, C_out2, k2, e2)
    ref2 = _reference(x2, params2, kernel_size=k2, stride=s2)

    out2 = separable_conv1d_pallas(x2, params2, kernel_size=k2, stride=s2,
                                   expand_ratio=e2, mxu_dtype=jnp.float32)
    out2 = jax.block_until_ready(out2)
    np.testing.assert_allclose(np.asarray(out2), np.asarray(ref2), rtol=1e-4, atol=1e-4)

    out2_bf16 = separable_conv1d_pallas(x2, params2, kernel_size=k2, stride=s2,
                                        expand_ratio=e2)   # default mxu_dtype=bfloat16
    out2_bf16 = jax.block_until_ready(out2_bf16)
    np.testing.assert_allclose(np.asarray(out2_bf16), np.asarray(ref2),
                               rtol=1e-1, atol=2e-1)

    print("KERNEL_OK")
</pallas_src>

<mosaic_0001>
module attributes {stable_mosaic.version = 11 : i64} {
  func.func @kernel(%arg0: i32, %arg1: i32, %arg2: memref<1x4x16xf32, #tpu.memory_space<vmem>>, %arg3: memref<3x8x1xf32, #tpu.memory_space<vmem>>, %arg4: memref<8x1xf32, #tpu.memory_space<vmem>>, %arg5: memref<8x8xf32, #tpu.memory_space<vmem>>, %arg6: memref<8x1xf32, #tpu.memory_space<vmem>>, %arg7: memref<1x8x16xf32, #tpu.memory_space<vmem>>, %arg8: memref<8x18xf32, #tpu.memory_space<vmem>>) attributes {dimension_semantics = [#tpu.dimension_semantics<parallel>, #tpu.dimension_semantics<arbitrary>], iteration_bounds = array<i64: 2, 1>, scalar_prefetch = 0 : i64, scratch_operands = 1 : i64, tpu.core_type = #tpu.core_type<tc>, window_params = [{transform_indices = @transform_0, window_bounds = array<i64: 1, 4, 16>}, {pipeline_mode = #tpu.pipeline_mode<synchronous>, transform_indices = @transform_1, window_bounds = array<i64: 3, 8, 1>}, {pipeline_mode = #tpu.pipeline_mode<synchronous>, transform_indices = @transform_2, window_bounds = array<i64: 8, 1>}, {pipeline_mode = #tpu.pipeline_mode<synchronous>, transform_indices = @transform_3, window_bounds = array<i64: 8, 8>}, {pipeline_mode = #tpu.pipeline_mode<synchronous>, transform_indices = @transform_4, window_bounds = array<i64: 8, 1>}, {transform_indices = @transform_5, window_bounds = array<i64: 1, 8, 16>}]} {
    %cst = arith.constant 0.000000e+00 : f32
    %0 = vector.broadcast %cst : f32 to vector<8x1xf32>
    %c0 = arith.constant 0 : index
    %c0_0 = arith.constant 0 : index
    %1 = vector.load %arg8[%c0, %c0_0] : memref<8x18xf32, #tpu.memory_space<vmem>>, vector<8x1xf32>
    tpu.vector_store %arg8[%c0, %c0_0], %0 {strides = array<i32>} : memref<8x18xf32, #tpu.memory_space<vmem>>, vector<8x1xf32>,
    %cst_1 = arith.constant 0.000000e+00 : f32
    %2 = vector.broadcast %cst_1 : f32 to vector<8x1xf32>
    %c0_2 = arith.constant 0 : index
    %c17 = arith.constant 17 : index
    %3 = vector.load %arg8[%c0_2, %c17] : memref<8x18xf32, #tpu.memory_space<vmem>>, vector<8x1xf32>
    tpu.vector_store %arg8[%c0_2, %c17], %2 {strides = array<i32>} : memref<8x18xf32, #tpu.memory_space<vmem>>, vector<8x1xf32>,
    %c0_3 = arith.constant 0 : index
    %c0_4 = arith.constant 0 : index
    %c0_5 = arith.constant 0 : index
    %4 = vector.load %arg2[%c0_3, %c0_4, %c0_5] : memref<1x4x16xf32, #tpu.memory_space<vmem>>, vector<1x4x16xf32>
    %5 = vector.shape_cast %4 : vector<1x4x16xf32> to vector<4x16xf32>
    %6 = tpu.concatenate %5, %5 in 0 : vector<4x16xf32>, vector<4x16xf32> -> vector<8x16xf32>
    %c0_6 = arith.constant 0 : index
    %c1 = arith.constant 1 : index
    %7 = vector.load %arg8[%c0_6, %c1] : memref<8x18xf32, #tpu.memory_space<vmem>>, vector<8x16xf32>
    tpu.vector_store %arg8[%c0_6, %c1], %6 {strides = array<i32>} : memref<8x18xf32, #tpu.memory_space<vmem>>, vector<8x16xf32>,
    %cst_7 = arith.constant 0.000000e+00 : f32
    %8 = vector.broadcast %cst_7 : f32 to vector<8x16xf32>
    %c0_8 = arith.constant 0 : index
    %c0_9 = arith.constant 0 : index
    %9 = vector.load %arg8[%c0_8, %c0_9] : memref<8x18xf32, #tpu.memory_space<vmem>>, vector<8x16xf32>
    %c0_10 = arith.constant 0 : index
    %c0_11 = arith.constant 0 : index
    %c0_12 = arith.constant 0 : index
    %10 = vector.load %arg3[%c0_10, %c0_11, %c0_12] : memref<3x8x1xf32, #tpu.memory_space<vmem>>, vector<1x8x1xf32>
    %11 = vector.shape_cast %10 : vector<1x8x1xf32> to vector<8x1xf32>
    %12 = vector.broadcast %11 : vector<8x1xf32> to vector<8x16xf32>
    %13 = arith.mulf %9, %12 : vector<8x16xf32>
    %14 = arith.addf %8, %13 : vector<8x16xf32>
    %c0_13 = arith.constant 0 : index
    %c1_14 = arith.constant 1 : index
    %15 = vector.load %arg8[%c0_13, %c1_14] : memref<8x18xf32, #tpu.memory_space<vmem>>, vector<8x16xf32>
    %c1_15 = arith.constant 1 : index
    %c0_16 = arith.constant 0 : index
    %c0_17 = arith.constant 0 : index
    %16 = vector.load %arg3[%c1_15, %c0_16, %c0_17] : memref<3x8x1xf32, #tpu.memory_space<vmem>>, vector<1x8x1xf32>
    %17 = vector.shape_cast %16 : vector<1x8x1xf32> to vector<8x1xf32>
    %18 = vector.broadcast %17 : vector<8x1xf32> to vector<8x16xf32>
    %19 = arith.mulf %15, %18 : vector<8x16xf32>
    %20 = arith.addf %14, %19 : vector<8x16xf32>
    %c0_18 = arith.constant 0 : index
    %c2 = arith.constant 2 : index
    %21 = vector.load %arg8[%c0_18, %c2] : memref<8x18xf32, #tpu.memory_space<vmem>>, vector<8x16xf32>
    %c2_19 = arith.constant 2 : index
    %c0_20 = arith.constant 0 : index
    %c0_21 = arith.constant 0 : index
    %22 = vector.load %arg3[%c2_19, %c0_20, %c0_21] : memref<3x8x1xf32, #tpu.memory_space<vmem>>, vector<1x8x1xf32>
    %23 = vector.shape_cast %22 : vector<1x8x1xf32> to vector<8x1xf32>
    %24 = vector.broadcast %23 : vector<8x1xf32> to vector<8x16xf32>
    %25 = arith.mulf %21, %24 : vector<8x16xf32>
    %26 = arith.addf %20, %25 : vector<8x16xf32>
    %c0_22 = arith.constant 0 : index
    %c0_23 = arith.constant 0 : index
    %27 = vector.load %arg4[%c0_22, %c0_23] : memref<8x1xf32, #tpu.memory_space<vmem>>, vector<8x1xf32>
    %28 = vector.broadcast %27 : vector<8x1xf32> to vector<8x16xf32>
    %29 = arith.addf %26, %28 : vector<8x16xf32>
    %cst_24 = arith.constant 0.000000e+00 : f32
    %30 = vector.broadcast %cst_24 : f32 to vector<8x16xf32>
    %31 = arith.maximumf %29, %30 : vector<8x16xf32>
    %c0_25 = arith.constant 0 : index
    %c0_26 = arith.constant 0 : index
    %32 = vector.load %arg5[%c0_25, %c0_26] : memref<8x8xf32, #tpu.memory_space<vmem>>, vector<8x8xf32>
    %cst_27 = arith.constant dense<0.000000e+00> : vector<8x16xf32>
    %33 = tpu.matmul %32, %31, %cst_27 {dimension_numbers = #tpu.dot_dimension_numbers<[1], [0], [0], [1], [0, 0, 1, 1], [], []>} : vector<8x8xf32>, vector<8x16xf32>, vector<8x16xf32> -> vector<8x16xf32>
    %c0_28 = arith.constant 0 : index
    %c0_29 = arith.constant 0 : index
    %34 = vector.load %arg6[%c0_28, %c0_29] : memref<8x1xf32, #tpu.memory_space<vmem>>, vector<8x1xf32>
    %35 = vector.broadcast %34 : vector<8x1xf32> to vector<8x16xf32>
    %36 = arith.addf %33, %35 : vector<8x16xf32>
    %c0_30 = arith.constant 0 : index
    %c0_31 = arith.constant 0 : index
    %c0_32 = arith.constant 0 : index
    %37 = vector.load %arg7[%c0_30, %c0_31, %c0_32] : memref<1x8x16xf32, #tpu.memory_space<vmem>>, vector<1x8x16xf32>
    %38 = vector.shape_cast %37 : vector<1x8x16xf32> to vector<8x16xf32>
    %39 = vector.shape_cast %36 : vector<8x16xf32> to vector<1x8x16xf32>
    tpu.vector_store %arg7[%c0_30, %c0_31, %c0_32], %39 {strides = array<i32>} : memref<1x8x16xf32, #tpu.memory_space<vmem>>, vector<1x8x16xf32>,
    return
  }
  func.func @transform_0(%arg0: i32, %arg1: i32) -> (i32, i32, i32) {
    %c0_i32 = arith.constant 0 : i32
    %c0_i32_0 = arith.constant 0 : i32
    %c0_i32_1 = arith.constant 0 : i32
    return %arg0, %c0_i32, %c0_i32_0 : i32, i32, i32
  }
  func.func @transform_1(%arg0: i32, %arg1: i32) -> (i32, i32, i32) {
    %c0_i32 = arith.constant 0 : i32
    %c0_i32_0 = arith.constant 0 : i32
    %c0_i32_1 = arith.constant 0 : i32
    %c0_i32_2 = arith.constant 0 : i32
    return %c0_i32, %c0_i32_0, %c0_i32_1 : i32, i32, i32
  }
  func.func @transform_2(%arg0: i32, %arg1: i32) -> (i32, i32) {
    %c0_i32 = arith.constant 0 : i32
    %c0_i32_0 = arith.constant 0 : i32
    %c0_i32_1 = arith.constant 0 : i32
    return %c0_i32, %c0_i32_0 : i32, i32
  }
  func.func @transform_3(%arg0: i32, %arg1: i32) -> (i32, i32) {
    %c0_i32 = arith.constant 0 : i32
    %c0_i32_0 = arith.constant 0 : i32
    %c0_i32_1 = arith.constant 0 : i32
    return %c0_i32, %c0_i32_0 : i32, i32
  }
  func.func @transform_4(%arg0: i32, %arg1: i32) -> (i32, i32) {
    %c0_i32 = arith.constant 0 : i32
    %c0_i32_0 = arith.constant 0 : i32
    %c0_i32_1 = arith.constant 0 : i32
    return %c0_i32, %c0_i32_0 : i32, i32
  }
  func.func @transform_5(%arg0: i32, %arg1: i32) -> (i32, i32, i32) {
    %c0_i32 = arith.constant 0 : i32
    %c0_i32_0 = arith.constant 0 : i32
    return %arg0, %c0_i32, %arg1 : i32, i32, i32
  }
}

</mosaic_0001>

<bundles_post_ra>
// kernel: tpu_custom_call.1
= control target key start
LH: loop header
LB: loop body
LE: loop exit
PB: predicated region body
PF: predicated region fallthrough
CT: control target
= control target key end

     0   :  { %10 = vsyncpa [#allocation4], 0  ;;  %s718_s0 = inlined_call_operand.vmem [shape: f32[2,4,16], index: 0, kind: input, shape index: {}]   ;;  %s719_s1 = inlined_call_operand.vmem [shape: f32[3,8,1], index: 1, kind: input, shape index: {}]   ;;  %s720_s2 = inlined_call_operand.vmem [shape: f32[8,1], index: 2, kind: input, shape index: {}]   ;;  %s721_s3 = inlined_call_operand.vmem [shape: f32[8,8], index: 3, kind: input, shape index: {}]   ;;  %s722_s4 = inlined_call_operand.vmem [shape: f32[8,1], index: 4, kind: input, shape index: {}]   ;;  %s723_s5 = inlined_call_operand.hbm [shape: f32[2,8,16], index: 5, kind: output, shape index: {}]  }
   0x1   :  { %12 = vsyncpa [#allocation4 + $0x1], 0  ;;  %s603_s18 = smov 0   ;;  %s605_s19 = smov 0  }
   0x2   :  { %s607_s20 = smov 0   ;;  %s609_s21 = smov 0  }
   0x3   :  { %s611_s22 = smov 0   ;;  %s613_s23 = smov 0  }
   0x4 LB: > { %s411_s24 = sadd.s32 4294967295, %s566_s23   ;;  %s412_s25 = sadd.s32 4294967294, %s566_s23   ;;  %s566_s23 = sphi %s613_s23, %s18_s23   ;;  %s562_s22 = sphi %s611_s22, %s730_s22   ;;  %s558_s21 = sphi %s609_s21, %s729_s21   ;;  %s554_s20 = sphi %s607_s20, %s728_s20   ;;  %s550_s19 = sphi %s605_s19, %s727_s19   ;;  %s546_s18 = sphi %s603_s18, %s726_s18  }
   0x5   : > { %s30_s26 = sadd.s32 1, %s562_s22  ;;  %s149_s27 = sadd.s32 1, %s554_s20 }
   0x6   : > { %p32_p0 = scmp.ge.s32.totalorder %s30_s26, 2  ;;  %p159_p1 = scmp.ne.s32.totalorder %s554_s20, %s550_s19 }
   0x7   : > { %p160_p2 = scmp.eq.s32.totalorder %s411_s24, 1  ;;  %p165_p3 = scmp.ne.s32.totalorder %s550_s19, %s546_s18 }
   0x8   : > { %s732_s26 = smov (%p32_p0, %s30_s26), 0  ;;  %p166_p5 = scmp.eq.s32.totalorder %s412_s25, 1 }
   0x9   : > { %p643_p4 = por %p160_p2, %p159_p1  ;;  %s144_s29 = ssub.s32 %s562_s22, %s732_s26 }
   0xa   : > { %p415_p6 = scmp.ge.s32.totalorder %s566_s23, 1  ;;  %p147_p7 = scmp.eq.s32.totalorder %s144_s29, 0 }
   0xb   : > { %p650_p8 = por %p166_p5, %p165_p3  ;;  %p203_p9 = scmp.lt.s32.totalorder %s566_s23, 3 }
   0xc   : > { %s656_s6 = scalar_select %p147_p7, %s554_s20, %s149_s27  }
   0xd   : > { %p204_p10 = pnand %p415_p6, %p203_p9 }
   0xe   : > { %p230_p11 = scmp.lt.s32.totalorder (!%p204_p10), %s558_s21, 1  ;;  %s569_s16 = smov (!%p204_p10), 1  }
   0xf   : > { %207 = sbr.rel (%p204_p10) target bundleno = 390 (0x186), region = 40  ;;  %s571_s29 = smov (!%p204_p10), 127  }
  0x10   : > { %s572_s7 = smov (!%p204_p10), 126   ;;  %s227_s12 = sand.u32 (!%p204_p10), 1, %s550_s19  }
  0x11   : > { %s422_s14 = sshll.u32 (!%p204_p10), %s558_s21, 3 }
  0x12   : > { %s338_s17 = scalar_lea.hbm (!%p204_p10), %s723_s5, %s422_s14 }
  0x13   : > { %s342_s27 = sshll.u32 (!%p204_p10), %s338_s17, 4  ;;  %s343_s27 = int_to_ptr.hbm [resolvable:$true] %s342_s27 }
  0x14   : > { %v419_v0 = vld [vmem:[%s719_s1 + $0x10] sm:$0xff]  ;;  %v568_v1 = vmov 0   ;;  %s231_s9 = scalar_select %p230_p11, %s558_s21, 1  ;;  %vm242_vm0 = vcmask 1043456   ;;  %v251_v4 = vld [vmem:[%s719_s1] sm:$0xff]  ;;  %v418_v6 = vld [vmem:[%s719_s1 + $0x8] sm:$0xff] }
  0x15   : > { %486 = vset.pattern.permute.xlu1 %v568_v1  ;;  %485 = vset.pattern.permute.xlu0 %v568_v1  ;;  %v285_v7 = vld [vmem:[%s720_s2] sm:$0xff]  ;;  %vm234_vm1 = vcmask 7168   ;;  %vm236_vm2 = vcmask 146568   ;;  %v570_v8 = vmov 0.0   ;;  %vm248_vm3 = vcmask 138248  }
  0x16   : > { %276 = vperm.xlu1 %486, %v419_v0   ;;  %487 = vset.pattern.permute.xlu2 %v568_v1  ;;  %s417_s10 = sshll.u32 %s231_s9, 2  ;;  %235 = vst.msk [vmem:[#allocation2] sm:$0xff] %vm234_vm1, %v570_v8  ;;  %v294_v15 = vld [vmem:[%s722_s4] sm:$0xff]  ;;  %vm300_vm4 = vcmask 64512   ;;  %vm324_vm5 = vcmask 130048  }
  0x17   : > { %s233_s13 = scalar_lea.vmem %s718_s0, %s417_s10  ;;  %237 = vst.msk [vmem:[#allocation2] sm:$0xff] %vm236_vm2, %v570_v8  ;;  %v293_v25 = vld [vmem:[%s721_s3] sm:$0xff]  ;;  %s508_s10 = scalar_lea.hbm %s723_s5, 16 }
  0x18   : > { %v238_v2 = vld [vmem:[%s233_s13] sm:$0xf]  ;;  %s416_s13 = sshll.u32 %s227_s12, 3 }
  0x19   : > { %v240_v3 = vrot.slane %v238_v2, 4  ;;  %s229_s24 = scalar_lea.vmem [#allocation3], %s416_s13 }
  0x1a   : > { %s340_s25 = sshll.u32 %s229_s24, 4  ;;  %s341_s25 = int_to_ptr.vmem [resolvable:$true] %s340_s25 }
  0x1b   : > { %v243_v5 = vsel %vm242_vm0, %v238_v2, %v240_v3 }
  0x1c   : > { %245 = vrot.lane.b32.xlu0 %v243_v5, %s569_s16 }
  0x1e   : > { %254 = vperm.xlu1 %486, %v251_v4  }
  0x24   : > { %263 = vperm.xlu0 %485, %v418_v6  }
  0x26   : > { %288 = vperm.xlu1 %486, %v285_v7  }
  0x88   : > { %v277_v13 = vpop.permute.xlu1 %276 }
  0x8e   : > { %v246_v9 = vpop.permute.xlu0 %245 }
  0x8f   : > { %249 = vst.msk [vmem:[#allocation2] sm:$0xff] %vm248_vm3, %v246_v9 }
  0x90   : > { %v255_v16 = vpop.permute.xlu1 %254 }
  0x96   : > { %v250_v10 = vld [vmem:[#allocation2] sm:$0xff]  ;;  %v264_v11 = vpop.permute.xlu0 %263 }
  0x97   : > { %v266_v12 = vmul.f32 %v264_v11, %v250_v10  ;;  %v279_v14 = vmul.f32 %v277_v13, %v250_v10  ;;  %v257_v18 = vmul.f32 %v255_v16, %v250_v10 }
  0x98   : > { %v289_v22 = vpop.permute.xlu1 %288 }
  0x99   : > { %268 = vrot.lane.b32.xlu2 %v266_v12, %s571_s29  ;;  %s327_s29 = scalar_lea.sflag [#allocation4], %s227_s12 }
  0xa1   : > { %281 = vrot.lane.b32.xlu2 %v279_v14, %s572_s7  ;;  %s502_s7 = sshra.s32 %s343_s27, 4  ;;  %s503_s7 = int_to_ptr.hbm [resolvable:$true] %s502_s7 }
  0xa2   : > { %s504_s8 = scalar_lea.hbm %s503_s7, 8  ;;  %p509_p1 = scmp.lt.s32.totalorder %s503_s7, %s723_s5 }
  0xa3   : > { %p505_p12 = scmp.ne.s32.totalorder %s503_s7, %s504_s8  ;;  %p510_p2 = scmp.lt.s32.totalorder %s508_s10, %s504_s8 }
  0xa5   : > { %p506_p13 = pnand %p505_p12, %p643_p4  ;;  %p511_p3 = por %p510_p2, %p509_p1 }
  0xa7   : > { %p507_p0 = pneg %p506_p13 }
  0xa9   : > { %297 = vperm.xlu2 %487, %v294_v15   ;;  %p512_p5 = pnand %p511_p3, %p507_p0 }
  0xf3   : > { %v269_v17 = vpop.permute.xlu2 %268 }
  0xf4   : > { %v271_v19 = vadd.f32 %v269_v17, %v257_v18 }
  0xfb   : > { %v282_v20 = vpop.permute.xlu2 %281 }
  0xfc   : > { %v284_v21 = vadd.f32 %v282_v20, %v271_v19 }
  0xfe   : > { %v291_v23 = vadd.f32 %v289_v22, %v284_v21 }
 0x100   : > { %v292_v24 = vmax.f32 %v291_v23, 0.0 }
 0x102   : > { %319 = vmatpush.msra.mxu0 %v292_v24 }
 0x103   : > { %420 = vmatmul.msk.f32.vlgmr.msra.gmra.mxu0 %vm300_vm4, %v293_v25  ;;  %v298_v26 = vpop.permute.xlu2 %297 }
 0x180   : > { %v321_v27 = vpop.f32.mrf.mxu0 }
 0x181   : > { %v322_v28 = vadd.f32 %v321_v27, %v298_v26 }
 0x183   : > { %325 = vst.msk [vmem:[%s229_s24] sm:$0xff] %vm324_vm5, %v322_v28 }
 0x184   : > { %515 = shalt.err (!%p512_p5)
}
 0x185   : > { %425 = dma.vmem_to_hbm [thread:$0]  (%p643_p4), %s341_s25, 128, %s343_s27, %s327_s29  }
 0x186 PF: > { %p431_p6 = scmp.ge.s32.totalorder %s566_s23, 2  ;;  %s354_s12 = sand.u32 1, %s546_s18  }
 0x187   : > { %s355_s14 = scalar_lea.sflag [#allocation4], %s354_s12 }
 0x188   : > { %p428_p7 = pnand %p431_p6, %p650_p8 }
 0x18a   : > { %p429_p9 = pneg %p428_p7 }
 0x18c   : > { %541 = dma.done.wait (%p429_p9), %s355_s14, 128  }
 0x18d   : > { %543 = vsyncadd (%p429_p9), %s355_s14, 4294967168  ;;  %s18_s23 = sadd.s32 1, %s566_s23   ;;  %s726_s18 = smov %s550_s19 }
 0x18e   : > { %p15_p10 = scmp.ge.s32.totalorder %s18_s23, 4   ;;  %s727_s19 = smov %s554_s20 }
 0x18f   : > { %s728_s20 = smov %s656_s6  ;;  %s729_s21 = smov %s562_s22 }
 0x190   : > { %s730_s22 = smov %s732_s26  ;;  %17 = sbr.rel (!%p15_p10) target bundleno = 4 (0x4), region = 77 }
 0x195   :  { %361 = vsyncpa [#allocation4], 1 }
 0x196   :  { %363 = vsyncpa [#allocation4 + $0x1], 1 }

</bundles_post_ra>
